<compile_context>
chip_gen: v5e
topology: v5e:2x2
jax: 0.10.0
libtpu: 0.0.40
codegen_flags: <defaults>
</compile_context>

<pallas_src>
import jax
import jax.numpy as jnp
from jax.experimental import pallas as pl
from jax.experimental.pallas import tpu as pltpu


def _round_up(x, m):
    return ((x + m - 1) // m) * m


def _d_gaussian_kernel(
    x_ref,                      # (1, TN)
    w1_ref, b1_ref,             # (10, 1), (10, 1)
    w2_ref, b2_ref,             # (10, 10), (10, 1)
    wc_ref, bc_ref,             # (1+2C, 10), (1+2C, 1)  head with layer-3 folded in
    out_ref,                    # (1+2C, TN)
):
    x = x_ref[...]                                              # (1, TN)

    # Layer 1 is a K=1 contraction -> VPU broadcast multiply-add (outer prod):
    # (10,1)*(1,TN) + (10,1) -> (10, TN)
    h = jnp.tanh(w1_ref[...] * x + b1_ref[...])

    # Layer 2 on the MXU, lane-dense (10, TN).
    h = jnp.tanh(
        jnp.dot(w2_ref[...], h, preferred_element_type=jnp.float32) + b2_ref[...]
    )

    # Fused (layer3 ∘ heads): one MXU matmul, one lane-dense store.
    out_ref[...] = (
        jnp.dot(wc_ref[...], h, preferred_element_type=jnp.float32) + bc_ref[...]
    ).astype(out_ref.dtype)


def d_gaussian_forward(x, params, *, tile_n=128 * 1024,
                       vmem_limit_bytes=48 * 1024 * 1024,
                       out_dtype=jnp.float32):
    """x: (N, 1) float32.  Returns (s, c, mi) matching the PyTorch module with
    AC=True: s -> (N,), c -> (N, num_classes), mi -> (N, num_classes)
    (squeeze(1) on (N, C>1) is a no-op, as in PyTorch)."""
    n = x.shape[0]
    num_classes = params["wa"].shape[1]
    heads = 1 + 2 * num_classes

    # ---- layout plumbing in the wrapper (not the kernel) --------------------
    xt = x.reshape(1, n)                                   # batch -> lane axis

    w1t = params["w1"].T                                   # (10, 1)
    b1t = params["b1"].reshape(-1, 1)                      # (10, 1)
    w2t = params["w2"].T                                   # (10, 10)
    b2t = params["b2"].reshape(-1, 1)                      # (10, 1)
    w3t = params["w3"].T                                   # (10, 10)
    b3t = params["b3"].reshape(-1, 1)                      # (10, 1)

    # Fuse gan | aux | mi heads into one (heads, 10) matrix + (heads, 1) bias,
    # then fold the (linear, no-tanh) third encoder layer into it:
    #   out = Wh @ (W3t @ h2 + b3t) + bh = (Wh@W3t) @ h2 + (Wh@b3t + bh)
    wh = jnp.concatenate(
        [params["wg"].T, params["wa"].T, params["wm"].T], axis=0)   # (heads, 10)
    bh = jnp.concatenate(
        [params["bg"].reshape(-1, 1),
         params["ba"].reshape(-1, 1),
         params["bm"].reshape(-1, 1)], axis=0)                      # (heads, 1)
    wc = wh @ w3t                                                   # (heads, 10)
    bc = wh @ b3t + bh                                              # (heads, 1)

    # ---- tile / pad the batch (lane) axis ----------------------------------
    n128 = _round_up(n, 128)
    tile = min(tile_n, n128)
    # Keep at least 2 grid steps when possible so v7x megacore can split the
    # (EUP-heavy) tanh work across both TensorCores.
    if n128 >= 2 * 128 and pl.cdiv(n128, tile) < 2:
        tile = _round_up(pl.cdiv(n128, 2), 128)
    n_pad = pl.cdiv(n, tile) * tile
    if n_pad != n:
        # For best end-to-end perf pass a tile-aligned N upstream; this pad
        # (and the slice below) each cost an extra HBM pass when triggered.
        xt = jnp.pad(xt, ((0, 0), (0, n_pad - n)))
    grid = (n_pad // tile,)

    def resident(a):
        # Weights/biases: full-array block, same block every grid step ->
        # VMEM-resident across the whole grid (tiny: < 2 KB total).
        return pl.BlockSpec(a.shape, lambda i: (0, 0))

    in_specs = [
        pl.BlockSpec((1, tile), lambda i: (0, i)),         # x tile
        resident(w1t), resident(b1t),
        resident(w2t), resident(b2t),
        resident(wc), resident(bc),
    ]
    out_spec = pl.BlockSpec((heads, tile), lambda i: (0, i))

    cost = pl.CostEstimate(
        flops=2 * (10 + 10 * 10 + heads * 10) * n_pad,
        transcendentals=20 * n_pad,
        bytes_accessed=(1 + heads) * 4 * n_pad,
    )

    out = pl.pallas_call(
        _d_gaussian_kernel,
        out_shape=jax.ShapeDtypeStruct((heads, n_pad), out_dtype),
        grid=grid,
        in_specs=in_specs,
        out_specs=out_spec,
        compiler_params=pltpu.CompilerParams(
            dimension_semantics=("parallel",),
            vmem_limit_bytes=vmem_limit_bytes),
        cost_estimate=cost,
    )(xt, w1t, b1t, w2t, b2t, wc, bc)

    if n_pad != n:
        out = out[:, :n]                                   # drop lane padding

    # Consumers that can take the fused (heads, N) layout should use `out`
    # directly; the transposes below only exist to match the PyTorch API.
    s = out[0]                                             # (N,)
    c = out[1:1 + num_classes].T                           # (N, C)
    mi = out[1 + num_classes:].T                           # (N, C)
    # PyTorch squeeze(1): no-op for C > 1, squeezes for C == 1.
    if num_classes == 1:
        c = jnp.squeeze(c, axis=1)
        mi = jnp.squeeze(mi, axis=1)
    return s, c, mi


def init_params(key, num_classes=3):
    """Deterministic parameter init (PyTorch-default-style small uniform).
    Stored in the natural (in_features, out_features) layout; the wrapper
    transposes / fuses once."""
    ks = jax.random.split(key, 12)

    def lin(kw, kb, fan_in, fan_out):
        bound = 1.0 / jnp.sqrt(fan_in)
        w = jax.random.uniform(kw, (fan_in, fan_out), jnp.float32, -bound, bound)
        b = jax.random.uniform(kb, (1, fan_out), jnp.float32, -bound, bound)
        return w, b

    w1, b1 = lin(ks[0], ks[1], 1, 10)
    w2, b2 = lin(ks[2], ks[3], 10, 10)
    w3, b3 = lin(ks[4], ks[5], 10, 10)
    wg, bg = lin(ks[6], ks[7], 10, 1)
    wa, ba = lin(ks[8], ks[9], 10, num_classes)
    wm, bm = lin(ks[10], ks[11], 10, num_classes)
    return dict(w1=w1, b1=b1, w2=w2, b2=b2, w3=w3, b3=b3,
                wg=wg, bg=bg, wa=wa, ba=ba, wm=wm, bm=bm)


def _reference_forward(x, p):
    h = jnp.tanh(x @ p["w1"] + p["b1"])
    h = jnp.tanh(h @ p["w2"] + p["b2"])
    h = h @ p["w3"] + p["b3"]
    s = (h @ p["wg"] + p["bg"]).squeeze(1)
    c = h @ p["wa"] + p["ba"]
    mi = h @ p["wm"] + p["bm"]
    return s, c, mi


if __name__ == "__main__":
    key = jax.random.PRNGKey(0)
    k_x, k_p = jax.random.split(key)

    batch = 8
    num_classes = 3
    x = jax.random.normal(k_x, (batch, 1), dtype=jnp.float32)   # 1-D Gaussian samples
    params = init_params(k_p, num_classes=num_classes)

    s, c, mi = d_gaussian_forward(x, params)
    jax.block_until_ready((s, c, mi))

    # sanity check vs pure-JAX reference
    s_ref, c_ref, mi_ref = _reference_forward(x, params)
    assert s.shape == (batch,)
    assert c.shape == (batch, num_classes)
    assert mi.shape == (batch, num_classes)
    assert jnp.allclose(s, s_ref, atol=1e-5)
    assert jnp.allclose(c, c_ref, atol=1e-5)
    assert jnp.allclose(mi, mi_ref, atol=1e-5)

    print("KERNEL_OK")
</pallas_src>

<mosaic_0001>
module attributes {stable_mosaic.version = 11 : i64} {
  func.func @_d_gaussian_kernel(%arg0: i32, %arg1: memref<1x128xf32, #tpu.memory_space<vmem>>, %arg2: memref<10x1xf32, #tpu.memory_space<vmem>>, %arg3: memref<10x1xf32, #tpu.memory_space<vmem>>, %arg4: memref<10x10xf32, #tpu.memory_space<vmem>>, %arg5: memref<10x1xf32, #tpu.memory_space<vmem>>, %arg6: memref<7x10xf32, #tpu.memory_space<vmem>>, %arg7: memref<7x1xf32, #tpu.memory_space<vmem>>, %arg8: memref<7x128xf32, #tpu.memory_space<vmem>>) attributes {dimension_semantics = [#tpu.dimension_semantics<parallel>], iteration_bounds = array<i64: 1>, scalar_prefetch = 0 : i64, scratch_operands = 0 : i64, tpu.core_type = #tpu.core_type<tc>, window_params = [{transform_indices = @transform_0, window_bounds = array<i64: 1, 128>}, {pipeline_mode = #tpu.pipeline_mode<synchronous>, transform_indices = @transform_1, window_bounds = array<i64: 10, 1>}, {pipeline_mode = #tpu.pipeline_mode<synchronous>, transform_indices = @transform_2, window_bounds = array<i64: 10, 1>}, {pipeline_mode = #tpu.pipeline_mode<synchronous>, transform_indices = @transform_3, window_bounds = array<i64: 10, 10>}, {pipeline_mode = #tpu.pipeline_mode<synchronous>, transform_indices = @transform_4, window_bounds = array<i64: 10, 1>}, {pipeline_mode = #tpu.pipeline_mode<synchronous>, transform_indices = @transform_5, window_bounds = array<i64: 7, 10>}, {pipeline_mode = #tpu.pipeline_mode<synchronous>, transform_indices = @transform_6, window_bounds = array<i64: 7, 1>}, {transform_indices = @transform_7, window_bounds = array<i64: 7, 128>}]} {
    %c0 = arith.constant 0 : index
    %c0_0 = arith.constant 0 : index
    %0 = vector.load %arg1[%c0, %c0_0] : memref<1x128xf32, #tpu.memory_space<vmem>>, vector<1x128xf32>
    %c0_1 = arith.constant 0 : index
    %c0_2 = arith.constant 0 : index
    %1 = vector.load %arg2[%c0_1, %c0_2] : memref<10x1xf32, #tpu.memory_space<vmem>>, vector<10x1xf32>
    %2 = vector.broadcast %1 : vector<10x1xf32> to vector<10x128xf32>
    %3 = vector.broadcast %0 : vector<1x128xf32> to vector<10x128xf32>
    %4 = arith.mulf %2, %3 : vector<10x128xf32>
    %c0_3 = arith.constant 0 : index
    %c0_4 = arith.constant 0 : index
    %5 = vector.load %arg3[%c0_3, %c0_4] : memref<10x1xf32, #tpu.memory_space<vmem>>, vector<10x1xf32>
    %6 = vector.broadcast %5 : vector<10x1xf32> to vector<10x128xf32>
    %7 = arith.addf %4, %6 : vector<10x128xf32>
    %8 = math.tanh %7 : vector<10x128xf32>
    %c0_5 = arith.constant 0 : index
    %c0_6 = arith.constant 0 : index
    %9 = vector.load %arg4[%c0_5, %c0_6] : memref<10x10xf32, #tpu.memory_space<vmem>>, vector<10x10xf32>
    %cst = arith.constant dense<0.000000e+00> : vector<10x128xf32>
    %10 = tpu.matmul %9, %8, %cst {dimension_numbers = #tpu.dot_dimension_numbers<[1], [0], [0], [1], [0, 0, 1, 1], [], []>} : vector<10x10xf32>, vector<10x128xf32>, vector<10x128xf32> -> vector<10x128xf32>
    %c0_7 = arith.constant 0 : index
    %c0_8 = arith.constant 0 : index
    %11 = vector.load %arg5[%c0_7, %c0_8] : memref<10x1xf32, #tpu.memory_space<vmem>>, vector<10x1xf32>
    %12 = vector.broadcast %11 : vector<10x1xf32> to vector<10x128xf32>
    %13 = arith.addf %10, %12 : vector<10x128xf32>
    %14 = math.tanh %13 : vector<10x128xf32>
    %c0_9 = arith.constant 0 : index
    %c0_10 = arith.constant 0 : index
    %15 = vector.load %arg6[%c0_9, %c0_10] : memref<7x10xf32, #tpu.memory_space<vmem>>, vector<7x10xf32>
    %cst_11 = arith.constant dense<0.000000e+00> : vector<7x128xf32>
    %16 = tpu.matmul %15, %14, %cst_11 {dimension_numbers = #tpu.dot_dimension_numbers<[1], [0], [0], [1], [0, 0, 1, 1], [], []>} : vector<7x10xf32>, vector<10x128xf32>, vector<7x128xf32> -> vector<7x128xf32>
    %c0_12 = arith.constant 0 : index
    %c0_13 = arith.constant 0 : index
    %17 = vector.load %arg7[%c0_12, %c0_13] : memref<7x1xf32, #tpu.memory_space<vmem>>, vector<7x1xf32>
    %18 = vector.broadcast %17 : vector<7x1xf32> to vector<7x128xf32>
    %19 = arith.addf %16, %18 : vector<7x128xf32>
    %c0_14 = arith.constant 0 : index
    %c0_15 = arith.constant 0 : index
    %20 = vector.load %arg8[%c0_14, %c0_15] : memref<7x128xf32, #tpu.memory_space<vmem>>, vector<7x128xf32>
    tpu.vector_store %arg8[%c0_14, %c0_15], %19 {strides = array<i32>} : memref<7x128xf32, #tpu.memory_space<vmem>>, vector<7x128xf32>,
    return
  }
  func.func @transform_0(%arg0: i32) -> (i32, i32) {
    %c0_i32 = arith.constant 0 : i32
    %c0_i32_0 = arith.constant 0 : i32
    return %c0_i32, %arg0 : i32, i32
  }
  func.func @transform_1(%arg0: i32) -> (i32, i32) {
    %c0_i32 = arith.constant 0 : i32
    %c0_i32_0 = arith.constant 0 : i32
    %c0_i32_1 = arith.constant 0 : i32
    return %c0_i32, %c0_i32_0 : i32, i32
  }
  func.func @transform_2(%arg0: i32) -> (i32, i32) {
    %c0_i32 = arith.constant 0 : i32
    %c0_i32_0 = arith.constant 0 : i32
    %c0_i32_1 = arith.constant 0 : i32
    return %c0_i32, %c0_i32_0 : i32, i32
  }
  func.func @transform_3(%arg0: i32) -> (i32, i32) {
    %c0_i32 = arith.constant 0 : i32
    %c0_i32_0 = arith.constant 0 : i32
    %c0_i32_1 = arith.constant 0 : i32
    return %c0_i32, %c0_i32_0 : i32, i32
  }
  func.func @transform_4(%arg0: i32) -> (i32, i32) {
    %c0_i32 = arith.constant 0 : i32
    %c0_i32_0 = arith.constant 0 : i32
    %c0_i32_1 = arith.constant 0 : i32
    return %c0_i32, %c0_i32_0 : i32, i32
  }
  func.func @transform_5(%arg0: i32) -> (i32, i32) {
    %c0_i32 = arith.constant 0 : i32
    %c0_i32_0 = arith.constant 0 : i32
    %c0_i32_1 = arith.constant 0 : i32
    return %c0_i32, %c0_i32_0 : i32, i32
  }
  func.func @transform_6(%arg0: i32) -> (i32, i32) {
    %c0_i32 = arith.constant 0 : i32
    %c0_i32_0 = arith.constant 0 : i32
    %c0_i32_1 = arith.constant 0 : i32
    return %c0_i32, %c0_i32_0 : i32, i32
  }
  func.func @transform_7(%arg0: i32) -> (i32, i32) {
    %c0_i32 = arith.constant 0 : i32
    %c0_i32_0 = arith.constant 0 : i32
    return %c0_i32, %arg0 : i32, i32
  }
}

</mosaic_0001>

<bundles_post_ra>
// kernel: tpu_custom_call.1
= control target key start
LH: loop header
LB: loop body
LE: loop exit
PB: predicated region body
PF: predicated region fallthrough
CT: control target
= control target key end

     0   :  { %v208_v2 = vmov 0   ;;  %s292_s0 = inlined_call_operand.vmem [shape: f32[1,128], index: 0, kind: input, shape index: {}]   ;;  %s293_s1 = inlined_call_operand.vmem [shape: f32[10,1], index: 1, kind: input, shape index: {}]   ;;  %s294_s2 = inlined_call_operand.vmem [shape: f32[10,1], index: 2, kind: input, shape index: {}]   ;;  %s295_s3 = inlined_call_operand.vmem [shape: f32[10,10], index: 3, kind: input, shape index: {}]   ;;  %s296_s4 = inlined_call_operand.vmem [shape: f32[10,1], index: 4, kind: input, shape index: {}]   ;;  %s297_s5 = inlined_call_operand.vmem [shape: f32[7,10], index: 5, kind: input, shape index: {}]   ;;  %s298_s6 = inlined_call_operand.vmem [shape: f32[7,1], index: 6, kind: input, shape index: {}]   ;;  %s299_s7 = inlined_call_operand.hbm [shape: f32[7,128], index: 7, kind: output, shape index: {}]  }
   0x1   :  { %v46_v0 = vld [vmem:[%s294_s2 + $0x8] sm:$0x3]  ;;  %171 = vset.pattern.permute.xlu1 %v208_v2  ;;  %170 = vset.pattern.permute.xlu0 %v208_v2 }
   0x2   :  { %v29_v1 = vld [vmem:[%s293_s1 + $0x8] sm:$0x3]  ;;  %54 = vperm.xlu1 %171, %v46_v0  }
   0x3   :  { %37 = vperm.xlu0 %170, %v29_v1  }
   0x4   :  { %12 = vsyncpa [#allocation3], 0  ;;  %172 = vset.pattern.permute.xlu2 %v208_v2  ;;  %v45_v3 = vld [vmem:[%s294_s2] sm:$0xff]  ;;  %v64_v6 = vld [vmem:[%s296_s4 + $0x8] sm:$0x3]  ;;  %vm82_vm0 = vcmask 1041408  }
   0x5   :  { %v28_v4 = vld [vmem:[%s293_s1] sm:$0xff]  ;;  %72 = vperm.xlu2 %172, %v64_v6   ;;  %vm75_vm1 = vcmask 80896   ;;  %v62_v19 = vld [vmem:[%s295_s3 + $0x8] sm:$0x3]  ;;  %s209_s17 = smov [#allocation2]   ;;  %s152_s21 = sshll.u32 %s299_s7, 4  ;;  %s153_s21 = int_to_ptr.hbm [resolvable:$true] %s152_s21 }
   0x6   :  { %v112_v5 = vld [vmem:[%s298_s6] sm:$0x7f]  ;;  %s150_s18 = sshll.u32 %s209_s17, 4  ;;  %s151_s18 = int_to_ptr.vmem [resolvable:$true] %s150_s18 }
   0x7   :  { %v63_v7 = vld [vmem:[%s296_s4] sm:$0xff] }
   0x8   :  { %v173_v8 = vld [vmem:[%s292_s0] ss:$0 sm:$0xff] }
   0x9   :  { %v61_v18 = vld [vmem:[%s295_s3] sm:$0xff] }
   0xa   :  { %49 = vperm.xlu1 %171, %v45_v3   ;;  %v111_v28 = vld [vmem:[%s297_s5] sm:$0x7f] }
   0xb   :  { %32 = vperm.xlu0 %170, %v28_v4  }
   0xd   :  { %67 = vperm.xlu2 %172, %v63_v7  }
  0x13   :  { %115 = vperm.xlu0 %170, %v112_v5  }
  0x5f   :  { %v73_v21 = vpop.permute.xlu2 %72 }
  0x67   :  { %v68_v22 = vpop.permute.xlu2 %67 }
  0x74   :  { %v55_v9 = vpop.permute.xlu1 %54 }
  0x75   :  { %v38_v10 = vpop.permute.xlu0 %37 }
  0x76   :  { %v44_v11 = vmul.f32 %v173_v8, %v38_v10 }
  0x78   :  { %v58_v12 = vadd.f32 %v55_v9, %v44_v11 }
  0x7a   :  { %174 = vtanh.f32 %v58_v12 }
  0x7c   :  { %v50_v15 = vpop.permute.xlu1 %49 }
  0x7d   :  { %v33_v13 = vpop.permute.xlu0 %32 }
  0x7e   :  { %v43_v14 = vmul.f32 %v173_v8, %v33_v13 }
  0x80   :  { %v175_v16 = vpop.eup %174  ;;  %v57_v17 = vadd.f32 %v50_v15, %v43_v14 }
  0x81   :  { %161 = vmatpush.msk.msra.mxu0 %vm82_vm0, %v175_v16  ;;  %166 = vmatpush.msk.msra.mxu2 %vm82_vm0, %v175_v16 }
  0x82   :  { %176 = vtanh.f32 %v57_v17 }
  0x85   :  { %v116_v30 = vpop.permute.xlu0 %115 }
  0x88   :  { %v177_v20 = vpop.eup %176 }
  0x89   :  { %101 = vmatpush.msra.mxu0 %v177_v20  ;;  %167 = vmatpush.msra.mxu2 %v177_v20 }
  0x8a   :  { %162 = vmatmul.msk.f32.vlgmr.msra.gmra.mxu0 %vm75_vm1, %v61_v18  ;;  %163 = vmatmul.msk.f32.vlgmr.msra.gmra.mxu2 %vm75_vm1, %v62_v19 }
 0x107   :  { %v103_v23 = vpop.f32.mrf.mxu0 }
 0x108   :  { %v104_v25 = vadd.f32 %v103_v23, %v68_v22 }
 0x10d   :  { %v106_v24 = vpop.f32.mrf.mxu2 }
 0x10e   :  { %v107_v26 = vadd.f32 %v106_v24, %v73_v21 }
 0x110   :  { %178 = vtanh.f32 %v107_v26 }
 0x111   :  { %180 = vtanh.f32 %v104_v25 }
 0x116   :  { %v179_v27 = vpop.eup %178 }
 0x117   :  { %164 = vmatpush.msk.msra.mxu1 %vm82_vm0, %v179_v27  ;;  %v181_v29 = vpop.eup %180 }
 0x119   :  { %139 = vmatpush.msra.mxu1 %v181_v29 }
 0x11a   :  { %165 = vmatmul.msk.f32.vlgmr.msra.gmra.mxu1 %vm75_vm1, %v111_v28 }
 0x197   :  { %v141_v31 = vpop.f32.mrf.mxu1 }
 0x198   :  { %v142_v32 = vadd.f32 %v141_v31, %v116_v30 }
 0x19a   :  { %144 = vst [vmem:[#allocation2] sm:$0x7f] %v142_v32 }
 0x19b   :  { %155 = dma.vmem_to_hbm [thread:$0]  %s151_s18, 128, %s153_s21, [#allocation3]  }
 0x19c   :  { %206 = dma.done.wait [#allocation3], 128  }
 0x19d   :  { %207 = vsyncadd [#allocation3], 4294967168 }
 0x19e   :  { %160 = vsyncpa [#allocation3], 1 }

</bundles_post_ra>
